<compile_context>
chip_gen: v6e
topology: v6e:2x2x1
jax: 0.10.0
libtpu: 0.0.40
codegen_flags: <defaults>
</compile_context>

<pallas_src>
import jax
import jax.numpy as jnp
import numpy as np
from jax.experimental import pallas as pl
from jax.experimental.pallas import tpu as pltpu


# ----------------------------------------------------------------------------
# Kernel: per-row feature MLP (n_input -> 32 -> 128 -> 512 -> 128 -> 32 -> n_out)
# ----------------------------------------------------------------------------
def feature_mlp_kernel(*refs):
    x_ref, out_ref = refs[0], refs[-1]
    wb_refs = refs[1:-1]                       # (w_bf16, b_f32) pairs, resident
    n_layers = len(wb_refs) // 2

    h = x_ref[...].astype(jnp.bfloat16)        # activations in bf16 for the MXU
    for li in range(n_layers):                 # static python loop -> unrolled
        w = wb_refs[2 * li][...]               # bf16 weights
        b = wb_refs[2 * li + 1][...]           # f32 bias (1, fan_out)
        h = jnp.dot(h, w, preferred_element_type=jnp.float32) + b
        if li < n_layers - 1:                  # ReLU on all but the output layer
            h = jnp.maximum(h, 0.0).astype(jnp.bfloat16)
    out_ref[...] = h                           # final layer kept in f32


# ----------------------------------------------------------------------------
# Wrapper
# ----------------------------------------------------------------------------
def _row_tile(n_rows, max_tile=1024, min_steps=4):
    """Row tile: multiple of 8 sublanes, >= min_steps grid steps when possible
    (keeps both v7x TensorCores busy + enables DMA/compute overlap), capped at
    max_tile to stay comfortably inside v5e/v7x VMEM budgets."""
    t = -(-n_rows // min_steps)
    t = ((t + 7) // 8) * 8
    return max(8, min(t, max_tile))


def _resident(arr):
    """Full-array block with a constant block index: stays VMEM-resident across
    the grid; single-buffered since its block never changes."""
    nd = arr.ndim
    return pl.BlockSpec(arr.shape, lambda i: (0,) * nd,
                        pipeline_mode=pl.Buffered(1))


def feature_mlp_pallas(x, feat_ws_bf16, feat_bs, n_output, max_tile=1024):
    n_rows, n_in = x.shape
    tile = _row_tile(n_rows, max_tile)
    grid = (pl.cdiv(n_rows, tile),)            # partial last block bounds-masked

    inputs = [x]
    in_specs = [pl.BlockSpec((tile, n_in), lambda i: (i, 0))]
    for w, b in zip(feat_ws_bf16, feat_bs):
        inputs += [w, b]
        in_specs += [_resident(w), _resident(b)]

    return pl.pallas_call(
        feature_mlp_kernel,
        out_shape=jax.ShapeDtypeStruct((n_rows, n_output), jnp.float32),
        grid=grid,
        in_specs=in_specs,
        # n_output (=2) lanes -> masked partial stores; dictated by the model.
        out_specs=pl.BlockSpec((tile, n_output), lambda i: (i, 0)),
        compiler_params=pltpu.CompilerParams(
            dimension_semantics=("parallel",),
            vmem_limit_bytes=48 * 1024 * 1024),
    )(*inputs)


def uda_forward_pallas(x_cat, x_cont, params, alpha=None):
    B, _, T_in = x_cat.shape
    n_output = params["feat_ws"][-1].shape[1]

    # glue: permute(0,2,1) + concat, flattened to (B*T_in, n_input) rows
    x = jnp.concatenate(
        [jnp.transpose(x_cat.astype(jnp.float32), (0, 2, 1)),
         jnp.transpose(x_cont.astype(jnp.float32), (0, 2, 1))], axis=-1)
    n_in = x.shape[-1]
    rows = x.reshape(B * T_in, n_in)

    class_pre = feature_mlp_pallas(rows, params["feat_ws_bf16"],
                                   params["feat_bs"], n_output)    # (B*T, n_out)
    class_pre = class_pre.reshape(B, T_in, n_output)

    # Temporal head + domain classifier: tiny (~11 KFLOP / batch element), run
    # as plain XLA per the perf review (a second pallas_call's dispatch cost
    # would dominate); kept in f32.
    cp_t = jnp.transpose(class_pre, (0, 2, 1))                     # (B, n_out, T_in)
    xt = jnp.maximum(cp_t @ params["w_tin"] + params["b_tin"], 0.0)  # (B, n_out, 128)
    class_output = xt @ params["w_tout"] + params["b_tout"]        # (B, n_out, T_out)

    flat = xt.reshape(B, n_output * 128)                           # (B, n_out*128)
    # TODO(synk): ReverseLayerF (gradient reversal) only affects the backward
    # pass; the forward pass is identity, so nothing to emit here.
    domain_output = flat @ params["w_dom"].T + params["b_dom"]     # (B, 1)
    return class_output, domain_output


# ----------------------------------------------------------------------------
# Parameter construction (matches MLPModelTimeSeriesNumericalUDA._init_weights)
# ----------------------------------------------------------------------------
def xavier_uniform(key, fan_out, fan_in):
    bound = np.sqrt(6.0 / (fan_in + fan_out))
    return jax.random.uniform(key, (fan_out, fan_in), jnp.float32, -bound, bound)


def make_params(key, n_cat, n_cont, T_in=10, T_out=10, n_output=2):
    n_input = n_cat + n_cont
    # lin_input, lin_hidden (32->128->512->128->32), lin_output
    dims = [(32, n_input), (128, 32), (512, 128), (128, 512), (32, 128),
            (n_output, 32)]
    keys = jax.random.split(key, len(dims) + 3)

    feat_ws, feat_bs = [], []
    for k, (fo, fi) in zip(keys[:len(dims)], dims):
        w = xavier_uniform(k, fo, fi)                    # PyTorch (out, in)
        feat_ws.append(w.T)                              # -> (in, out) for x @ W
        feat_bs.append(jnp.full((1, fo), 0.01, jnp.float32))
    feat_ws_bf16 = [w.astype(jnp.bfloat16) for w in feat_ws]   # cast once

    w_tin = xavier_uniform(keys[-3], 128, T_in).T        # (T_in, 128)
    b_tin = jnp.full((1, 128), 0.01, jnp.float32)
    w_tout = xavier_uniform(keys[-2], T_out, 128).T      # (128, T_out)
    b_tout = jnp.full((1, T_out), 0.01, jnp.float32)

    # domain classifier Linear(n_output*128, 1) (shape-consistent custom head)
    w_dom = xavier_uniform(keys[-1], 1, n_output * 128)  # (1, n_output*128)
    b_dom = jnp.full((1, 1), 0.01, jnp.float32)

    return dict(feat_ws=feat_ws, feat_ws_bf16=feat_ws_bf16, feat_bs=feat_bs,
                w_tin=w_tin, b_tin=b_tin, w_tout=w_tout, b_tout=b_tout,
                w_dom=w_dom, b_dom=b_dom)


# ----------------------------------------------------------------------------
# Pure-JAX f32 reference of the PyTorch forward (T_in > 1 branch)
# ----------------------------------------------------------------------------
def ref_forward(x_cat, x_cont, params):
    x1 = jnp.transpose(x_cat.astype(jnp.float32), (0, 2, 1))
    x2 = jnp.transpose(x_cont.astype(jnp.float32), (0, 2, 1))
    x = jnp.concatenate([x1, x2], axis=-1)                        # (B, T, n_in)
    for w, b in zip(params["feat_ws"][:-1], params["feat_bs"][:-1]):
        x = jnp.maximum(x @ w + b, 0.0)
    class_output = x @ params["feat_ws"][-1] + params["feat_bs"][-1]
    xt = jnp.maximum(jnp.transpose(class_output, (0, 2, 1)) @ params["w_tin"]
                     + params["b_tin"], 0.0)                      # (B, n_out, 128)
    class_output = xt @ params["w_tout"] + params["b_tout"]       # (B, n_out, T_out)
    B, f, t = xt.shape
    flat = xt.reshape(B, f * t)                                   # (B, n_out*128)
    domain_output = flat @ params["w_dom"].T + params["b_dom"]    # (B, 1)
    return class_output, domain_output


if __name__ == "__main__":
    B, n_cat, n_cont, T_in, T_out, n_output = 2, 3, 4, 10, 10, 2

    key = jax.random.PRNGKey(0)
    k_param, k_cat, k_cont = jax.random.split(key, 3)
    params = make_params(k_param, n_cat, n_cont, T_in, T_out, n_output)

    x_cat = jax.random.randint(k_cat, (B, n_cat, T_in), 0, 5).astype(jnp.float32)
    x_cont = jax.random.normal(k_cont, (B, n_cont, T_in), jnp.float32)

    fwd = jax.jit(uda_forward_pallas)
    class_out, domain_out = fwd(x_cat, x_cont, params)
    class_out, domain_out = jax.block_until_ready((class_out, domain_out))

    ref_class, ref_domain = ref_forward(x_cat, x_cont, params)
    assert class_out.shape == (B, n_output, T_out)
    assert domain_out.shape == (B, 1)
    # tolerance accounts for bf16 MXU matmuls (f32 accumulation) in the kernel
    np.testing.assert_allclose(np.asarray(class_out), np.asarray(ref_class),
                               rtol=2e-2, atol=2e-2)
    np.testing.assert_allclose(np.asarray(domain_out), np.asarray(ref_domain),
                               rtol=2e-2, atol=2e-2)
    print("KERNEL_OK")
</pallas_src>

<mosaic_0001>
module attributes {stable_mosaic.version = 11 : i64} {
  func.func @feature_mlp_kernel(%arg0: i32, %arg1: memref<8x7xf32, #tpu.memory_space<vmem>>, %arg2: memref<7x32xbf16, #tpu.memory_space<vmem>>, %arg3: memref<1x32xf32, #tpu.memory_space<vmem>>, %arg4: memref<32x128xbf16, #tpu.memory_space<vmem>>, %arg5: memref<1x128xf32, #tpu.memory_space<vmem>>, %arg6: memref<128x512xbf16, #tpu.memory_space<vmem>>, %arg7: memref<1x512xf32, #tpu.memory_space<vmem>>, %arg8: memref<512x128xbf16, #tpu.memory_space<vmem>>, %arg9: memref<1x128xf32, #tpu.memory_space<vmem>>, %arg10: memref<128x32xbf16, #tpu.memory_space<vmem>>, %arg11: memref<1x32xf32, #tpu.memory_space<vmem>>, %arg12: memref<32x2xbf16, #tpu.memory_space<vmem>>, %arg13: memref<1x2xf32, #tpu.memory_space<vmem>>, %arg14: memref<8x2xf32, #tpu.memory_space<vmem>>) attributes {dimension_semantics = [#tpu.dimension_semantics<parallel>], iteration_bounds = array<i64: 3>, scalar_prefetch = 0 : i64, scratch_operands = 0 : i64, tpu.core_type = #tpu.core_type<tc>, window_params = [{transform_indices = @transform_0, window_bounds = array<i64: 8, 7>}, {pipeline_mode = #tpu.pipeline_mode<synchronous>, transform_indices = @transform_1, window_bounds = array<i64: 7, 32>}, {pipeline_mode = #tpu.pipeline_mode<synchronous>, transform_indices = @transform_2, window_bounds = array<i64: 1, 32>}, {pipeline_mode = #tpu.pipeline_mode<synchronous>, transform_indices = @transform_3, window_bounds = array<i64: 32, 128>}, {pipeline_mode = #tpu.pipeline_mode<synchronous>, transform_indices = @transform_4, window_bounds = array<i64: 1, 128>}, {pipeline_mode = #tpu.pipeline_mode<synchronous>, transform_indices = @transform_5, window_bounds = array<i64: 128, 512>}, {pipeline_mode = #tpu.pipeline_mode<synchronous>, transform_indices = @transform_6, window_bounds = array<i64: 1, 512>}, {pipeline_mode = #tpu.pipeline_mode<synchronous>, transform_indices = @transform_7, window_bounds = array<i64: 512, 128>}, {pipeline_mode = #tpu.pipeline_mode<synchronous>, transform_indices = @transform_8, window_bounds = array<i64: 1, 128>}, {pipeline_mode = #tpu.pipeline_mode<synchronous>, transform_indices = @transform_9, window_bounds = array<i64: 128, 32>}, {pipeline_mode = #tpu.pipeline_mode<synchronous>, transform_indices = @transform_10, window_bounds = array<i64: 1, 32>}, {pipeline_mode = #tpu.pipeline_mode<synchronous>, transform_indices = @transform_11, window_bounds = array<i64: 32, 2>}, {pipeline_mode = #tpu.pipeline_mode<synchronous>, transform_indices = @transform_12, window_bounds = array<i64: 1, 2>}, {transform_indices = @transform_13, window_bounds = array<i64: 8, 2>}]} {
    %c0 = arith.constant 0 : index
    %c0_0 = arith.constant 0 : index
    %0 = vector.load %arg1[%c0, %c0_0] : memref<8x7xf32, #tpu.memory_space<vmem>>, vector<8x7xf32>
    %1 = arith.truncf %0 : vector<8x7xf32> to vector<8x7xbf16>
    %c0_1 = arith.constant 0 : index
    %c0_2 = arith.constant 0 : index
    %2 = vector.load %arg2[%c0_1, %c0_2] : memref<7x32xbf16, #tpu.memory_space<vmem>>, vector<7x32xbf16>
    %c0_3 = arith.constant 0 : index
    %c0_4 = arith.constant 0 : index
    %3 = vector.load %arg3[%c0_3, %c0_4] : memref<1x32xf32, #tpu.memory_space<vmem>>, vector<1x32xf32>
    %cst = arith.constant dense<0.000000e+00> : vector<8x32xf32>
    %4 = tpu.matmul %1, %2, %cst {dimension_numbers = #tpu.dot_dimension_numbers<[1], [0], [0], [1], [0, 0, 1, 1], [], []>} : vector<8x7xbf16>, vector<7x32xbf16>, vector<8x32xf32> -> vector<8x32xf32>
    %5 = vector.broadcast %3 : vector<1x32xf32> to vector<8x32xf32>
    %6 = arith.addf %4, %5 : vector<8x32xf32>
    %cst_5 = arith.constant 0.000000e+00 : f32
    %7 = vector.broadcast %cst_5 : f32 to vector<8x32xf32>
    %8 = arith.maximumf %6, %7 : vector<8x32xf32>
    %9 = arith.truncf %8 : vector<8x32xf32> to vector<8x32xbf16>
    %c0_6 = arith.constant 0 : index
    %c0_7 = arith.constant 0 : index
    %10 = vector.load %arg4[%c0_6, %c0_7] : memref<32x128xbf16, #tpu.memory_space<vmem>>, vector<32x128xbf16>
    %c0_8 = arith.constant 0 : index
    %c0_9 = arith.constant 0 : index
    %11 = vector.load %arg5[%c0_8, %c0_9] : memref<1x128xf32, #tpu.memory_space<vmem>>, vector<1x128xf32>
    %cst_10 = arith.constant dense<0.000000e+00> : vector<8x128xf32>
    %12 = tpu.matmul %9, %10, %cst_10 {dimension_numbers = #tpu.dot_dimension_numbers<[1], [0], [0], [1], [0, 0, 1, 1], [], []>} : vector<8x32xbf16>, vector<32x128xbf16>, vector<8x128xf32> -> vector<8x128xf32>
    %13 = vector.broadcast %11 : vector<1x128xf32> to vector<8x128xf32>
    %14 = arith.addf %12, %13 : vector<8x128xf32>
    %cst_11 = arith.constant 0.000000e+00 : f32
    %15 = vector.broadcast %cst_11 : f32 to vector<8x128xf32>
    %16 = arith.maximumf %14, %15 : vector<8x128xf32>
    %17 = arith.truncf %16 : vector<8x128xf32> to vector<8x128xbf16>
    %c0_12 = arith.constant 0 : index
    %c0_13 = arith.constant 0 : index
    %18 = vector.load %arg6[%c0_12, %c0_13] : memref<128x512xbf16, #tpu.memory_space<vmem>>, vector<128x512xbf16>
    %c0_14 = arith.constant 0 : index
    %c0_15 = arith.constant 0 : index
    %19 = vector.load %arg7[%c0_14, %c0_15] : memref<1x512xf32, #tpu.memory_space<vmem>>, vector<1x512xf32>
    %cst_16 = arith.constant dense<0.000000e+00> : vector<8x512xf32>
    %20 = tpu.matmul %17, %18, %cst_16 {dimension_numbers = #tpu.dot_dimension_numbers<[1], [0], [0], [1], [0, 0, 1, 1], [], []>} : vector<8x128xbf16>, vector<128x512xbf16>, vector<8x512xf32> -> vector<8x512xf32>
    %21 = vector.broadcast %19 : vector<1x512xf32> to vector<8x512xf32>
    %22 = arith.addf %20, %21 : vector<8x512xf32>
    %cst_17 = arith.constant 0.000000e+00 : f32
    %23 = vector.broadcast %cst_17 : f32 to vector<8x512xf32>
    %24 = arith.maximumf %22, %23 : vector<8x512xf32>
    %25 = arith.truncf %24 : vector<8x512xf32> to vector<8x512xbf16>
    %c0_18 = arith.constant 0 : index
    %c0_19 = arith.constant 0 : index
    %26 = vector.load %arg8[%c0_18, %c0_19] : memref<512x128xbf16, #tpu.memory_space<vmem>>, vector<512x128xbf16>
    %c0_20 = arith.constant 0 : index
    %c0_21 = arith.constant 0 : index
    %27 = vector.load %arg9[%c0_20, %c0_21] : memref<1x128xf32, #tpu.memory_space<vmem>>, vector<1x128xf32>
    %cst_22 = arith.constant dense<0.000000e+00> : vector<8x128xf32>
    %28 = tpu.matmul %25, %26, %cst_22 {dimension_numbers = #tpu.dot_dimension_numbers<[1], [0], [0], [1], [0, 0, 1, 1], [], []>} : vector<8x512xbf16>, vector<512x128xbf16>, vector<8x128xf32> -> vector<8x128xf32>
    %29 = vector.broadcast %27 : vector<1x128xf32> to vector<8x128xf32>
    %30 = arith.addf %28, %29 : vector<8x128xf32>
    %cst_23 = arith.constant 0.000000e+00 : f32
    %31 = vector.broadcast %cst_23 : f32 to vector<8x128xf32>
    %32 = arith.maximumf %30, %31 : vector<8x128xf32>
    %33 = arith.truncf %32 : vector<8x128xf32> to vector<8x128xbf16>
    %c0_24 = arith.constant 0 : index
    %c0_25 = arith.constant 0 : index
    %34 = vector.load %arg10[%c0_24, %c0_25] : memref<128x32xbf16, #tpu.memory_space<vmem>>, vector<128x32xbf16>
    %c0_26 = arith.constant 0 : index
    %c0_27 = arith.constant 0 : index
    %35 = vector.load %arg11[%c0_26, %c0_27] : memref<1x32xf32, #tpu.memory_space<vmem>>, vector<1x32xf32>
    %cst_28 = arith.constant dense<0.000000e+00> : vector<8x32xf32>
    %36 = tpu.matmul %33, %34, %cst_28 {dimension_numbers = #tpu.dot_dimension_numbers<[1], [0], [0], [1], [0, 0, 1, 1], [], []>} : vector<8x128xbf16>, vector<128x32xbf16>, vector<8x32xf32> -> vector<8x32xf32>
    %37 = vector.broadcast %35 : vector<1x32xf32> to vector<8x32xf32>
    %38 = arith.addf %36, %37 : vector<8x32xf32>
    %cst_29 = arith.constant 0.000000e+00 : f32
    %39 = vector.broadcast %cst_29 : f32 to vector<8x32xf32>
    %40 = arith.maximumf %38, %39 : vector<8x32xf32>
    %41 = arith.truncf %40 : vector<8x32xf32> to vector<8x32xbf16>
    %c0_30 = arith.constant 0 : index
    %c0_31 = arith.constant 0 : index
    %42 = vector.load %arg12[%c0_30, %c0_31] : memref<32x2xbf16, #tpu.memory_space<vmem>>, vector<32x2xbf16>
    %c0_32 = arith.constant 0 : index
    %c0_33 = arith.constant 0 : index
    %43 = vector.load %arg13[%c0_32, %c0_33] : memref<1x2xf32, #tpu.memory_space<vmem>>, vector<1x2xf32>
    %cst_34 = arith.constant dense<0.000000e+00> : vector<8x2xf32>
    %44 = tpu.matmul %41, %42, %cst_34 {dimension_numbers = #tpu.dot_dimension_numbers<[1], [0], [0], [1], [0, 0, 1, 1], [], []>} : vector<8x32xbf16>, vector<32x2xbf16>, vector<8x2xf32> -> vector<8x2xf32>
    %45 = vector.broadcast %43 : vector<1x2xf32> to vector<8x2xf32>
    %46 = arith.addf %44, %45 : vector<8x2xf32>
    %c0_35 = arith.constant 0 : index
    %c0_36 = arith.constant 0 : index
    %47 = vector.load %arg14[%c0_35, %c0_36] : memref<8x2xf32, #tpu.memory_space<vmem>>, vector<8x2xf32>
    tpu.vector_store %arg14[%c0_35, %c0_36], %46 {strides = array<i32>} : memref<8x2xf32, #tpu.memory_space<vmem>>, vector<8x2xf32>,
    return
  }
  func.func @transform_0(%arg0: i32) -> (i32, i32) {
    %c0_i32 = arith.constant 0 : i32
    %c0_i32_0 = arith.constant 0 : i32
    return %arg0, %c0_i32 : i32, i32
  }
  func.func @transform_1(%arg0: i32) -> (i32, i32) {
    %c0_i32 = arith.constant 0 : i32
    %c0_i32_0 = arith.constant 0 : i32
    %c0_i32_1 = arith.constant 0 : i32
    return %c0_i32, %c0_i32_0 : i32, i32
  }
  func.func @transform_2(%arg0: i32) -> (i32, i32) {
    %c0_i32 = arith.constant 0 : i32
    %c0_i32_0 = arith.constant 0 : i32
    %c0_i32_1 = arith.constant 0 : i32
    return %c0_i32, %c0_i32_0 : i32, i32
  }
  func.func @transform_3(%arg0: i32) -> (i32, i32) {
    %c0_i32 = arith.constant 0 : i32
    %c0_i32_0 = arith.constant 0 : i32
    %c0_i32_1 = arith.constant 0 : i32
    return %c0_i32, %c0_i32_0 : i32, i32
  }
  func.func @transform_4(%arg0: i32) -> (i32, i32) {
    %c0_i32 = arith.constant 0 : i32
    %c0_i32_0 = arith.constant 0 : i32
    %c0_i32_1 = arith.constant 0 : i32
    return %c0_i32, %c0_i32_0 : i32, i32
  }
  func.func @transform_5(%arg0: i32) -> (i32, i32) {
    %c0_i32 = arith.constant 0 : i32
    %c0_i32_0 = arith.constant 0 : i32
    %c0_i32_1 = arith.constant 0 : i32
    return %c0_i32, %c0_i32_0 : i32, i32
  }
  func.func @transform_6(%arg0: i32) -> (i32, i32) {
    %c0_i32 = arith.constant 0 : i32
    %c0_i32_0 = arith.constant 0 : i32
    %c0_i32_1 = arith.constant 0 : i32
    return %c0_i32, %c0_i32_0 : i32, i32
  }
  func.func @transform_7(%arg0: i32) -> (i32, i32) {
    %c0_i32 = arith.constant 0 : i32
    %c0_i32_0 = arith.constant 0 : i32
    %c0_i32_1 = arith.constant 0 : i32
    return %c0_i32, %c0_i32_0 : i32, i32
  }
  func.func @transform_8(%arg0: i32) -> (i32, i32) {
    %c0_i32 = arith.constant 0 : i32
    %c0_i32_0 = arith.constant 0 : i32
    %c0_i32_1 = arith.constant 0 : i32
    return %c0_i32, %c0_i32_0 : i32, i32
  }
  func.func @transform_9(%arg0: i32) -> (i32, i32) {
    %c0_i32 = arith.constant 0 : i32
    %c0_i32_0 = arith.constant 0 : i32
    %c0_i32_1 = arith.constant 0 : i32
    return %c0_i32, %c0_i32_0 : i32, i32
  }
  func.func @transform_10(%arg0: i32) -> (i32, i32) {
    %c0_i32 = arith.constant 0 : i32
    %c0_i32_0 = arith.constant 0 : i32
    %c0_i32_1 = arith.constant 0 : i32
    return %c0_i32, %c0_i32_0 : i32, i32
  }
  func.func @transform_11(%arg0: i32) -> (i32, i32) {
    %c0_i32 = arith.constant 0 : i32
    %c0_i32_0 = arith.constant 0 : i32
    %c0_i32_1 = arith.constant 0 : i32
    return %c0_i32, %c0_i32_0 : i32, i32
  }
  func.func @transform_12(%arg0: i32) -> (i32, i32) {
    %c0_i32 = arith.constant 0 : i32
    %c0_i32_0 = arith.constant 0 : i32
    %c0_i32_1 = arith.constant 0 : i32
    return %c0_i32, %c0_i32_0 : i32, i32
  }
  func.func @transform_13(%arg0: i32) -> (i32, i32) {
    %c0_i32 = arith.constant 0 : i32
    %c0_i32_0 = arith.constant 0 : i32
    return %arg0, %c0_i32 : i32, i32
  }
}

</mosaic_0001>

<bundles_post_ra>
// kernel: uda_forward_pallas.1
= control target key start
LH: loop header
LB: loop body
LE: loop exit
PB: predicated region body
PF: predicated region fallthrough
CT: control target
= control target key end

     0   :  { %18 = vsyncpa [#allocation3], 0  ;;  %s2130_s0 = inlined_call_operand.vmem [shape: f32[20,7], index: 0, kind: input, shape index: {}]   ;;  %s2131_s1 = inlined_call_operand.vmem [shape: bf16[7,32], index: 1, kind: input, shape index: {}]   ;;  %s2132_s2 = inlined_call_operand.vmem [shape: f32[1,32], index: 2, kind: input, shape index: {}]   ;;  %s2133_s3 = inlined_call_operand.vmem [shape: bf16[32,128], index: 3, kind: input, shape index: {}]   ;;  %s2134_s4 = inlined_call_operand.vmem [shape: f32[1,128], index: 4, kind: input, shape index: {}]   ;;  %s2135_s5 = inlined_call_operand.hbm [shape: bf16[128,512], index: 5, kind: input, shape index: {}]   ;;  %s2136_s6 = inlined_call_operand.vmem [shape: f32[1,512], index: 6, kind: input, shape index: {}]   ;;  %s2137_s7 = inlined_call_operand.hbm [shape: bf16[512,128], index: 7, kind: input, shape index: {}]   ;;  %s2138_s8 = inlined_call_operand.vmem [shape: f32[1,128], index: 8, kind: input, shape index: {}]   ;;  %s2139_s9 = inlined_call_operand.vmem [shape: bf16[128,32], index: 9, kind: input, shape index: {}]   ;;  %s2140_s10 = inlined_call_operand.vmem [shape: f32[1,32], index: 10, kind: input, shape index: {}]   ;;  %s2141_s11 = inlined_call_operand.vmem [shape: bf16[32,2], index: 11, kind: input, shape index: {}]   ;;  %s2142_s12 = inlined_call_operand.vmem [shape: f32[1,2], index: 12, kind: input, shape index: {}]   ;;  %s2143_s13 = inlined_call_operand.vmem [shape: f32[20,2], index: 13, kind: output, shape index: {}]  }
   0x1   :  { %19 = vsyncpa [#allocation5], 0  ;;  %s1981_s25 = smov 0  }
   0x2 LB: > { %s1901_s26 = smov [#allocation2]   ;;  %s1987_s28 = sadd.s32 4294967295, %s1899_s25   ;;  %s1899_s25 = sphi %s1981_s25, %s25_s25  }
   0x3   : > { %s358_s27 = sshll.u32 %s1901_s26, 4  ;;  %p1506_p0 = scmp.ge.s32.totalorder %s1899_s25, 1  ;;  %s359_s27 = int_to_ptr.vmem [resolvable:$true] %s358_s27 }
   0x4   : > { %p334_p1 = scmp.lt.s32.totalorder %s1899_s25, 4  ;;  %p1719_p3 = scmp.eq.s32.totalorder %s1987_s28, 0 }
   0x5   : > { %s1902_s30 = smov [#allocation4]   ;;  %s1844_s16 = scalar_lea.vmem %s359_s27, 4096 }
   0x6   : > { %p1991_p2 = pnand %p1506_p0, %p334_p1  ;;  %s374_s14 = sshll.u32 %s1902_s30, 4  ;;  %s375_s14 = int_to_ptr.vmem [resolvable:$true] %s374_s14 }
   0x7   : > { %p1845_p7 = scmp.ne.s32.totalorder %s359_s27, %s1844_s16  ;;  %p1852_p10 = scmp.lt.s32.totalorder %s359_s27, %s359_s27 }
   0x8   : > { %p1712_p4 = pneg %p1991_p2  ;;  %p1853_p11 = scmp.lt.s32.totalorder %s1844_s16, %s1844_s16 }
   0xa   : > { %p2000_p5 = pnand %p1719_p3, %p1712_p4  ;;  %p1854_p12 = por %p1853_p11, %p1852_p10 }
   0xc   : > { %p1835_p6 = pneg %p2000_p5 }
   0xe   : > { %p1847_p8 = pnand %p1845_p7, %p1835_p6 }
  0x10   : > { %p1848_p9 = pneg %p1847_p8 }
  0x12   : > { %p1855_p13 = pnand %p1854_p12, %p1848_p9 }
  0x14   : > { %1858 = shalt.err (!%p1855_p13)
}
  0x15   : > { %s1903_s17 = smov 256   ;;  %s1904_s18 = smov 16  }
  0x16   : > { %1715 = dma.hbm_to_vmem [thread:$0]  (!%p2000_p5), %s2135_s5, 4096, %s359_s27, [#allocation3], %s1903_s17, %s1903_s17, %s1904_s18  }
  0x17   : > { %s1870_s21 = scalar_lea.vmem %s375_s14, 4096  ;;  %p1878_p7 = scmp.lt.s32.totalorder %s375_s14, %s375_s14 }
  0x18   : > { %p1871_p0 = scmp.ne.s32.totalorder %s375_s14, %s1870_s21  ;;  %p1879_p8 = scmp.lt.s32.totalorder %s1870_s21, %s1870_s21 }
  0x1a   : > { %p1873_p1 = pnand %p1871_p0, %p1835_p6  ;;  %p1880_p10 = por %p1879_p8, %p1878_p7 }
  0x1c   : > { %p1874_p4 = pneg %p1873_p1 }
  0x1e   : > { %p1881_p9 = pnand %p1880_p10, %p1874_p4 }
  0x20   : > { %1884 = shalt.err (!%p1881_p9)
}
  0x21   : > { %s1905_s22 = smov 64   ;;  %s1906_s23 = smov 4  }
  0x22   : > { %1718 = dma.hbm_to_vmem [thread:$0]  (!%p2000_p5), %s2137_s7, 4096, %s375_s14, [#allocation5], %s1905_s22, %s1905_s22, %s1906_s23  }
  0x23   : > { %412 = sbr.rel (%p1991_p2) target bundleno = 1255 (0x4e7), region = 72 }
  0x28   : > { %1890 = dma.done.wait (%p1719_p3), [#allocation3], 4096  }
  0x29   : > { %1892 = vsyncadd (%p1719_p3), [#allocation3], 4294963200 }
  0x2a   : > { %1894 = dma.done.wait (%p1719_p3), [#allocation5], 4096  }
  0x2b   : > { %1896 = vsyncadd (%p1719_p3), [#allocation5], 4294963200  ;;  %vm481_vm0 = vcmask 1042432   ;;  %v1907_v0 = vmov 0.0   ;;  %p458_p5 = scmp.lt.s32.totalorder %s1987_s28, 2  ;;  %vm482_vm1 = vcmask 1043456  }
  0x2c   : > { %1662 = vmatprep.subr.bf16.mxu1 %v1907_v0  ;;  %v1908_v1 = vmov 65535   ;;  %vm1909_vm2 = vmmov 0   ;;  %v469_v4 = vld [vmem:[%s2131_s1] sm:$0xf]  ;;  %v1741_v7 = vld [vmem:[%s2133_s3 + $0x8] sm:$0xff]   ;;  %vm477_vm3 = vcmask 56320  }
  0x2d   : > { %v483_v2 = vsel %vm481_vm0, 4294967295, %v1908_v1  ;;  %1664 = vmatprep.mubr.msk.bf16.mxu1 %vm1909_vm2, %v1907_v0  ;;  %s2147_s28 = smov (!%p458_p5, %s1987_s28), 2  ;;  %v1742_v9 = vld [vmem:[%s2133_s3] sm:$0xff]   ;;  %v1747_v11 = vld [vmem:[#allocation2 + $0xec] ss:$16 sps:$4 sm:$0xff]   ;;  %vm553_vm4 = vcmask 261120  }
  0x2e   : > { %v484_v3 = vsel %vm482_vm1, %v483_v2, 0  ;;  %s1513_s27 = sshll.u32 %s2147_s28, 3  ;;  %v1743_v10 = vld [vmem:[#allocation2 + $0xe4] ss:$16 sps:$4 sm:$0xff]   ;;  %v1748_v12 = vld [vmem:[#allocation2 + $0xe0] ss:$16 sps:$4 sm:$0xff]  }
  0x2f   : > { %s461_s14 = scalar_lea.vmem %s2130_s0, %s1513_s27  ;;  %v486_v6 = vand.u32 %v484_v3, %v469_v4  ;;  %v1749_v13 = vld [vmem:[#allocation2 + $0xc4] ss:$16 sps:$4 sm:$0xff]   ;;  %813 = vmatprep.subr.bf16.mxu0 %v1743_v10  ;;  %v1754_v14 = vld [vmem:[#allocation2 + $0xc0] ss:$16 sps:$4 sm:$0xff]   ;;  %v1745_v30 = vld [vmem:[#allocation2 + $0xe8] ss:$16 sps:$4 sm:$0xff]   ;;  %s465_s30 = scalar_lea.vmem %s2143_s13, %s1513_s27 }
  0x30   : > { %v467_v5 = vld [vmem:[%s461_s14] sm:$0xff]  ;;  %814 = vmatpush1.bf16.msra.mxu0 %v1748_v12  ;;  %v1753_v32 = vld [vmem:[#allocation2 + $0xcc] ss:$16 sps:$4 sm:$0xff]   ;;  %v1751_v34 = vld [vmem:[#allocation2 + $0xc8] ss:$16 sps:$4 sm:$0xff]   ;;  %v1910_v50 = vmov 0  }
  0x31   : > { %v468_v8 = vpack.c.bf16 %v467_v5, %v467_v5  ;;  %1663 = vmatpush3.bf16.msra.mxu1 %v486_v6  ;;  %815 = vmatprep.subr.bf16.mxu0 %v1749_v13  ;;  %v1755_v15 = vld [vmem:[#allocation2 + $0xa4] ss:$16 sps:$4 sm:$0xff]   ;;  %v1760_v16 = vld [vmem:[#allocation2 + $0xa0] ss:$16 sps:$4 sm:$0xff]   ;;  %v1759_v35 = vld [vmem:[#allocation2 + $0xac] ss:$16 sps:$4 sm:$0xff]  }
  0x32   : > { %1668 = vmatprep.subr.bf16.mxu1 %v1907_v0  ;;  %v1761_v17 = vld [vmem:[#allocation2 + $0x84] ss:$16 sps:$4 sm:$0xff]   ;;  %v1766_v18 = vld [vmem:[#allocation2 + $0x80] ss:$16 sps:$4 sm:$0xff]   ;;  %v1757_v36 = vld [vmem:[#allocation2 + $0xa8] ss:$16 sps:$4 sm:$0xff]   ;;  %845 = vmatprep.mubr.bf16.mxu0 %v1910_v50 }
  0x33   : > { %v1767_v19 = vld [vmem:[#allocation2 + $0x64] ss:$16 sps:$4 sm:$0xff]   ;;  %v1772_v20 = vld [vmem:[#allocation2 + $0x60] ss:$16 sps:$4 sm:$0xff]   ;;  %v1765_v37 = vld [vmem:[#allocation2 + $0x8c] ss:$16 sps:$4 sm:$0xff]  }
  0x34   : > { %1665 = vmatmul.mubr.msk.bf16.vlgmr.msra.gmra.mxu1 %vm477_vm3, %v468_v8  ;;  %816 = vmatpush1.bf16.msra.mxu0 %v1754_v14  ;;  %v1773_v21 = vld [vmem:[#allocation2 + $0x44] ss:$16 sps:$4 sm:$0xff]   ;;  %v1778_v22 = vld [vmem:[#allocation2 + $0x40] ss:$16 sps:$4 sm:$0xff]   ;;  %v1763_v38 = vld [vmem:[#allocation2 + $0x88] ss:$16 sps:$4 sm:$0xff]  }
  0x35   : > { %1669 = vmatpush3.bf16.msra.mxu1 %v1741_v7  ;;  %1672 = vmatprep.mubr.msk.bf16.mxu1 %vm1909_vm2, %v1907_v0  ;;  %v1779_v23 = vld [vmem:[#allocation2 + $0x24] ss:$16 sps:$4 sm:$0xff]   ;;  %v1515_v24 = vld [vmem:[%s2132_s2] ss:$0 sm:$0xff]  ;;  %v1771_v39 = vld [vmem:[#allocation2 + $0x6c] ss:$16 sps:$4 sm:$0xff]  }
  0x36   : > { %1670 = vmatprep.subr.bf16.mxu1 %v1907_v0  ;;  %817 = vmatprep.subr.bf16.mxu0 %v1755_v15  ;;  %v1769_v40 = vld [vmem:[#allocation2 + $0x68] ss:$16 sps:$4 sm:$0xff]   ;;  %v1777_v41 = vld [vmem:[#allocation2 + $0x4c] ss:$16 sps:$4 sm:$0xff]   ;;  %v1784_v45 = vld [vmem:[#allocation2 + $0x20] ss:$16 sps:$4 sm:$0xff]  }
  0x37   : > { %v1775_v42 = vld [vmem:[#allocation2 + $0x48] ss:$16 sps:$4 sm:$0xff]   ;;  %v1783_v43 = vld [vmem:[#allocation2 + $0x2c] ss:$16 sps:$4 sm:$0xff]   ;;  %v1785_v46 = vld [vmem:[#allocation2 + $0x4] ss:$16 sps:$4 sm:$0xff]  }
  0x38   : > { %818 = vmatpush1.bf16.msra.mxu0 %v1760_v16  ;;  %v1781_v44 = vld [vmem:[#allocation2 + $0x28] ss:$16 sps:$4 sm:$0xff]   ;;  %v1789_v47 = vld [vmem:[#allocation2 + $0xc] ss:$16 sps:$4 sm:$0xff]   ;;  %v1790_v49 = vld [vmem:[#allocation2] ss:$16 sps:$4 sm:$0xff]  }
  0x39   : > { %1671 = vmatpush3.bf16.msra.mxu1 %v1742_v9  ;;  %819 = vmatprep.subr.bf16.mxu0 %v1761_v17  ;;  %v1787_v48 = vld [vmem:[#allocation2 + $0x8] ss:$16 sps:$4 sm:$0xff]   ;;  %v1517_v53 = vld [vmem:[%s2134_s4] ss:$0 sm:$0xff]  ;;  %v1795_v62 = vld [vmem:[#allocation4 + $0x70] sm:$0xff]   ;;  %vm1427_vm5 = vcmask 15360  }
  0x3a   : > { %854 = vmatprep.subr.bf16.mxu1 %v1747_v11  ;;  %v1791_v51 = vld [vmem:[#allocation4 + $0x78] sm:$0xff]   ;;  %v1796_v63 = vld [vmem:[#allocation4 + $0xf0] sm:$0xff]   ;;  %v1799_v4 = vld [vmem:[#allocation4 + $0x68] sm:$0xff]  }
  0x3b   : > { %v1792_v52 = vld [vmem:[#allocation4 + $0xf8] sm:$0xff]   ;;  %v1797_v2 = vld [vmem:[#allocation4 + $0x30] sm:$0xff]   ;;  %v1800_v5 = vld [vmem:[#allocation4 + $0xe8] sm:$0xff]  }
  0x3c   : > { %820 = vmatpush1.bf16.msra.mxu0 %v1766_v18  ;;  %v1793_v59 = vld [vmem:[#allocation4 + $0x38] sm:$0xff]   ;;  %v1798_v3 = vld [vmem:[#allocation4 + $0xb0] sm:$0xff]   ;;  %v1801_v6 = vld [vmem:[#allocation4 + $0x28] sm:$0xff]  }
  0x3d   : > { %821 = vmatprep.subr.bf16.mxu0 %v1767_v19  ;;  %v1794_v60 = vld [vmem:[#allocation4 + $0xb8] sm:$0xff]   ;;  %v1802_v7 = vld [vmem:[#allocation4 + $0xa8] sm:$0xff]   ;;  %v1803_v8 = vld [vmem:[#allocation4 + $0x60] sm:$0xff]  }
  0x3e   : > { %v1804_v9 = vld [vmem:[#allocation4 + $0xe0] sm:$0xff]   ;;  %v1807_v12 = vld [vmem:[#allocation4 + $0x58] sm:$0xff]   ;;  %v1811_v16 = vld [vmem:[#allocation4 + $0x50] sm:$0xff]  }
  0x3f   : > { %v1805_v10 = vld [vmem:[#allocation4 + $0x20] sm:$0xff]   ;;  %v1808_v13 = vld [vmem:[#allocation4 + $0xd8] sm:$0xff]   ;;  %v1812_v17 = vld [vmem:[#allocation4 + $0xd0] sm:$0xff]  }
  0x40   : > { %822 = vmatpush1.bf16.msra.mxu0 %v1772_v20  ;;  %v1806_v11 = vld [vmem:[#allocation4 + $0xa0] sm:$0xff]   ;;  %v1809_v14 = vld [vmem:[#allocation4 + $0x18] sm:$0xff]   ;;  %v1813_v18 = vld [vmem:[#allocation4 + $0x10] sm:$0xff]  }
  0x41   : > { %823 = vmatprep.subr.bf16.mxu0 %v1773_v21  ;;  %v1810_v15 = vld [vmem:[#allocation4 + $0x98] sm:$0xff]   ;;  %v1814_v19 = vld [vmem:[#allocation4 + $0x90] sm:$0xff]   ;;  %v1815_v20 = vld [vmem:[#allocation4 + $0x48] sm:$0xff]  }
  0x42   : > { %v1816_v21 = vld [vmem:[#allocation4 + $0xc8] sm:$0xff]  }
  0x44   : > { %824 = vmatpush1.bf16.msra.mxu0 %v1778_v22  ;;  %v1817_v22 = vld [vmem:[#allocation4 + $0x8] sm:$0xff]  }
  0x45   : > { %825 = vmatprep.subr.bf16.mxu0 %v1779_v23  ;;  %v1818_v23 = vld [vmem:[#allocation4 + $0x88] sm:$0xff]  }
  0x48   : > { %826 = vmatpush1.bf16.msra.mxu0 %v1784_v45 }
  0x49   : > { %827 = vmatprep.subr.bf16.mxu0 %v1785_v46 }
  0x4c   : > { %828 = vmatpush1.bf16.msra.mxu0 %v1790_v49 }
  0x4d   : > { %1606 = vmatprep.subr.bf16.mxu0 %v1791_v51 }
  0xf4   : > { %v522_v25 = vpop.f32.mrf.mxu1 }
  0xf5   : > { %v523_v26 = vadd.f32 %v1515_v24, %v522_v25  ;;  %v1819_v24 = vld [vmem:[#allocation4 + $0x40] sm:$0xff]  }
  0xf6   : > { %v1666_v27 = vpop.f32.mrf.mxu1  ;;  %v1820_v25 = vld [vmem:[#allocation4 + $0xc0] sm:$0xff]  }
  0xf7   : > { %v528_v28 = vmax.f32 %v523_v26, 0.0  ;;  %v1821_v26 = vld [vmem:[#allocation4] sm:$0xff]  }
  0xf8   : > { %v525_v29 = vpop.f32.mrf.mxu1  ;;  %v1822_v27 = vld [vmem:[#allocation4 + $0x80] sm:$0xff]  }
  0xf9   : > { %v529_v31 = vpack.c.bf16 %v528_v28, %v528_v28  ;;  %v633_v28 = vlaneseq }
  0xfa   : > { %v1667_v33 = vpop.f32.mrf.mxu1 }
  0xfb   : > { %1673 = vmatmul.mubr.msk.bf16.vlgmr.msra.gmra.mxu1 %vm553_vm4, %v529_v31  ;;  %v634_v29 = vshrl.u32 %v633_v28, 7  ;;  %v1595_v28 = vld [vmem:[%s2142_s12] ss:$0 sm:$0xff] }
  0xfc   : > { %855 = vmatpush1.bf16.msra.mxu1 %v1745_v30  ;;  %886 = vmatprep.mubr.bf16.mxu1 %v1910_v50 }
  0xfd   : > { %856 = vmatprep.subr.bf16.mxu1 %v1753_v32  ;;  %v635_v30 = vsub.s32 0, %v634_v29  ;;  %v643_v31 = vsub.s32 2, %v634_v29  ;;  %v631_v32 = vld [vmem:[%s2136_s6] sm:$0xf]  ;;  %v639_v33 = vsub.s32 1, %v634_v29 }
 0x100   : > { %857 = vmatpush1.bf16.msra.mxu1 %v1751_v34  ;;  %v647_v34 = vsub.s32 3, %v634_v29 }
 0x101   : > { %858 = vmatprep.subr.bf16.mxu1 %v1759_v35  ;;  %v636_v35 = vrot.slane %v631_v32, %v635_v30 }
 0x104   : > { %859 = vmatpush1.bf16.msra.mxu1 %v1757_v36  ;;  %v644_v36 = vrot.slane %v631_v32, %v643_v31 }
 0x105   : > { %860 = vmatprep.subr.bf16.mxu1 %v1765_v37  ;;  %v640_v37 = vrot.slane %v631_v32, %v639_v33 }
 0x108   : > { %861 = vmatpush1.bf16.msra.mxu1 %v1763_v38  ;;  %v648_v38 = vrot.slane %v631_v32, %v647_v34 }
 0x109   : > { %862 = vmatprep.subr.bf16.mxu1 %v1771_v39 }
 0x10c   : > { %863 = vmatpush1.bf16.msra.mxu1 %v1769_v40 }
 0x10d   : > { %864 = vmatprep.subr.bf16.mxu1 %v1777_v41 }
 0x110   : > { %865 = vmatpush1.bf16.msra.mxu1 %v1775_v42 }
 0x111   : > { %866 = vmatprep.subr.bf16.mxu1 %v1783_v43 }
 0x114   : > { %867 = vmatpush1.bf16.msra.mxu1 %v1781_v44 }
 0x115   : > { %868 = vmatprep.subr.bf16.mxu1 %v1789_v47 }
 0x118   : > { %869 = vmatpush1.bf16.msra.mxu1 %v1787_v48 }
 0x119   : > { %1628 = vmatprep.subr.bf16.mxu1 %v1792_v52 }
 0x1bb   : > { %v591_v54 = vpop.f32.mrf.mxu1 }
 0x1bc   : > { %v592_v55 = vadd.f32 %v1517_v53, %v591_v54 }
 0x1bd   : > { %v1674_v56 = vpop.f32.mrf.mxu1 }
 0x1be   : > { %v597_v57 = vmax.f32 %v592_v55, 0.0 }
 0x1bf   : > { %v594_v58 = vpop.f32.mrf.mxu1 }
 0x1c0   : > { %v598_v61 = vpack.c.bf16 %v597_v57, %v597_v57  ;;  %v1823_v57 = vld [vmem:[%s2139_s9 + $0x38] sm:$0xff]  }
 0x1c1   : > { %v1675_v1 = vpop.f32.mrf.mxu1 }
 0x1c2   : > { %846 = vmatmul.mubr.bf16.vlgmr.msra.gmra.mxu0 %v598_v61  ;;  %887 = vmatmul.mubr.bf16.vlgmr.msra.gmra.mxu1 %v598_v61  ;;  %v1825_v61 = vld [vmem:[%s2139_s9 + $0x28] sm:$0xff]   ;;  %v1828_v1 = vld [vmem:[%s2139_s9 + $0x10] sm:$0xff]  }
 0x1c3   : > { %1607 = vmatpush3.bf16.msra.mxu0 %v1793_v59  ;;  %1629 = vmatpush3.bf16.msra.mxu1 %v1794_v60  ;;  %v1824_v60 = vld [vmem:[%s2139_s9 + $0x30] sm:$0xff]  }
 0x1c4   : > { %1608 = vmatprep.subr.bf16.mxu0 %v1795_v62  ;;  %1630 = vmatprep.subr.bf16.mxu1 %v1796_v63  ;;  %v1826_v62 = vld [vmem:[%s2139_s9 + $0x20] sm:$0xff]   ;;  %v1827_v63 = vld [vmem:[%s2139_s9 + $0x18] sm:$0xff]  }
 0x1c7   : > { %1609 = vmatpush3.bf16.msra.mxu0 %v1797_v2  ;;  %1631 = vmatpush3.bf16.msra.mxu1 %v1798_v3  ;;  %v1829_v2 = vld [vmem:[%s2139_s9 + $0x8] sm:$0xff]   ;;  %v1830_v3 = vld [vmem:[%s2139_s9] sm:$0xff]  }
 0x1c8   : > { %1610 = vmatprep.subr.bf16.mxu0 %v1799_v4  ;;  %1632 = vmatprep.subr.bf16.mxu1 %v1800_v5  ;;  %v1831_v4 = vld [vmem:[%s2141_s11 + $0x8] sm:$0xff]  }
 0x1cb   : > { %1611 = vmatpush3.bf16.msra.mxu0 %v1801_v6  ;;  %1633 = vmatpush3.bf16.msra.mxu1 %v1802_v7  ;;  %v1553_v7 = vld [vmem:[%s2138_s8] ss:$0 sm:$0xff] }
 0x1cc   : > { %1612 = vmatprep.subr.bf16.mxu0 %v1803_v8  ;;  %1634 = vmatprep.subr.bf16.mxu1 %v1804_v9 }
 0x1cf   : > { %1613 = vmatpush3.bf16.msra.mxu0 %v1805_v10  ;;  %1635 = vmatpush3.bf16.msra.mxu1 %v1806_v11 }
 0x1d0   : > { %1614 = vmatprep.subr.bf16.mxu0 %v1807_v12  ;;  %1636 = vmatprep.subr.bf16.mxu1 %v1808_v13 }
 0x1d3   : > { %1615 = vmatpush3.bf16.msra.mxu0 %v1809_v14  ;;  %1637 = vmatpush3.bf16.msra.mxu1 %v1810_v15 }
 0x1d4   : > { %1616 = vmatprep.subr.bf16.mxu0 %v1811_v16  ;;  %1638 = vmatprep.subr.bf16.mxu1 %v1812_v17 }
 0x1d7   : > { %1617 = vmatpush3.bf16.msra.mxu0 %v1813_v18  ;;  %1639 = vmatpush3.bf16.msra.mxu1 %v1814_v19 }
 0x1d8   : > { %1618 = vmatprep.subr.bf16.mxu0 %v1815_v20  ;;  %1640 = vmatprep.subr.bf16.mxu1 %v1816_v21  ;;  %v1586_v20 = vld [vmem:[%s2140_s10] ss:$0 sm:$0xff] }
 0x1db   : > { %1619 = vmatpush3.bf16.msra.mxu0 %v1817_v22  ;;  %1641 = vmatpush3.bf16.msra.mxu1 %v1818_v23 }
 0x1dc   : > { %1620 = vmatprep.subr.bf16.mxu0 %v1819_v24  ;;  %1642 = vmatprep.subr.bf16.mxu1 %v1820_v25 }
 0x1df   : > { %1621 = vmatpush3.bf16.msra.mxu0 %v1821_v26  ;;  %1643 = vmatpush3.bf16.msra.mxu1 %v1822_v27 }
 0x1e0   : > { %1676 = vmatprep.subr.bf16.mxu0 %v1907_v0  ;;  %1696 = vmatprep.subr.bf16.mxu1 %v1907_v0 }
 0x282   : > { %v847_v39 = vpop.f32.mrf.mxu0  ;;  %v888_v40 = vpop.f32.mrf.mxu1 }
 0x283   : > { %v848_v41 = vadd.f32 %v847_v39, %v636_v35  ;;  %v889_v42 = vadd.f32 %v888_v40, %v644_v36 }
 0x284   : > { %v849_v43 = vpop.f32.mrf.mxu0  ;;  %v890_v44 = vpop.f32.mrf.mxu1 }
 0x285   : > { %v850_v45 = vadd.f32 %v849_v43, %v640_v37  ;;  %v891_v46 = vadd.f32 %v890_v44, %v648_v38  ;;  %v895_v47 = vmax.f32 %v848_v41, 0.0  ;;  %v897_v48 = vmax.f32 %v889_v42, 0.0 }
 0x286   : > { %v851_v49 = vpop.f32.mrf.mxu0  ;;  %v892_v50 = vpop.f32.mrf.mxu1 }
 0x287   : > { %v896_v51 = vmax.f32 %v850_v45, 0.0  ;;  %v898_v52 = vmax.f32 %v891_v46, 0.0  ;;  %v899_v58 = vpack.c.bf16 %v895_v47, %v895_v47  ;;  %v901_v59 = vpack.c.bf16 %v897_v48, %v897_v48 }
 0x288   : > { %v852_v53 = vpop.f32.mrf.mxu0  ;;  %v893_v54 = vpop.f32.mrf.mxu1 }
 0x289   : > { %v900_v55 = vpack.c.bf16 %v896_v51, %v896_v51  ;;  %v902_v56 = vpack.c.bf16 %v898_v52, %v898_v52 }
 0x28b   : > { %1198 = vmatprep.mubr.bf16.mxu0 %v900_v55  ;;  %1238 = vmatprep.mubr.bf16.mxu1 %v902_v56 }
 0x28c   : > { %1199 = vmatmul.mubr.bf16.vlgmr.msra.gmra.mxu0 %v899_v58  ;;  %1239 = vmatmul.mubr.bf16.vlgmr.msra.gmra.mxu1 %v901_v59 }
 0x28d   : > { %1677 = vmatpush3.bf16.msra.mxu0 %v1823_v57  ;;  %1692 = vmatprep.mubr.msk.bf16.mxu0 %vm1909_vm2, %v1907_v0 }
 0x28e   : > { %1678 = vmatprep.subr.bf16.mxu0 %v1907_v0  ;;  %1700 = vmatprep.mubr.msk.bf16.mxu1 %vm1909_vm2, %v1907_v0 }
 0x28f   : > { %1697 = vmatpush3.bf16.msra.mxu1 %v1831_v4 }
 0x290   : > { %1698 = vmatprep.subr.bf16.mxu1 %v1907_v0 }
 0x291   : > { %1679 = vmatpush3.bf16.msra.mxu0 %v1824_v60 }
 0x292   : > { %1680 = vmatprep.subr.bf16.mxu0 %v1907_v0 }
 0x295   : > { %1681 = vmatpush3.bf16.msra.mxu0 %v1825_v61 }
 0x296   : > { %1682 = vmatprep.subr.bf16.mxu0 %v1907_v0 }
 0x299   : > { %1683 = vmatpush3.bf16.msra.mxu0 %v1826_v62 }
 0x29a   : > { %1684 = vmatprep.subr.bf16.mxu0 %v1907_v0 }
 0x29d   : > { %1685 = vmatpush3.bf16.msra.mxu0 %v1827_v63 }
 0x29e   : > { %1686 = vmatprep.subr.bf16.mxu0 %v1907_v0 }
 0x2a1   : > { %1687 = vmatpush3.bf16.msra.mxu0 %v1828_v1 }
 0x2a2   : > { %1688 = vmatprep.subr.bf16.mxu0 %v1907_v0 }
 0x2a5   : > { %1689 = vmatpush3.bf16.msra.mxu0 %v1829_v2 }
 0x2a6   : > { %1690 = vmatprep.subr.bf16.mxu0 %v1907_v0  ;;  %v1832_v0 = vld [vmem:[%s2141_s11] sm:$0xff]  }
 0x2a7   : > { %1699 = vmatpush3.bf16.msra.mxu1 %v1832_v0 }
 0x2a9   : > { %1691 = vmatpush3.bf16.msra.mxu0 %v1830_v3 }
 0x34c   : > { %v1622_v5 = vpop.f32.mrf.mxu0  ;;  %v1644_v6 = vpop.f32.mrf.mxu1 }
 0x34e   : > { %v1623_v8 = vpop.f32.mrf.mxu0  ;;  %v1645_v9 = vpop.f32.mrf.mxu1 }
 0x34f   : > { %v1624_v10 = vadd.f32 %v1623_v8, %v1622_v5  ;;  %v1646_v14 = vadd.f32 %v1645_v9, %v1644_v6 }
 0x350   : > { %v1625_v11 = vpop.f32.mrf.mxu0  ;;  %v1647_v12 = vpop.f32.mrf.mxu1 }
 0x351   : > { %v1201_v13 = vadd.f32 %v1624_v10, %v1553_v7 }
 0x352   : > { %v1626_v15 = vpop.f32.mrf.mxu0  ;;  %v1648_v16 = vpop.f32.mrf.mxu1 }
 0x353   : > { %v1241_v17 = vadd.f32 %v1646_v14, %v1201_v13 }
 0x355   : > { %v1246_v18 = vmax.f32 %v1241_v17, 0.0 }
 0x357   : > { %v1247_v19 = vpack.c.bf16 %v1246_v18, %v1246_v18 }
 0x359   : > { %1693 = vmatmul.mubr.bf16.vlgmr.msra.gmra.mxu0 %v1247_v19 }
 0x419   : > { %v1353_v21 = vpop.f32.mrf.mxu0 }
 0x41a   : > { %v1354_v22 = vadd.f32 %v1586_v20, %v1353_v21 }
 0x41b   : > { %v1694_v23 = vpop.f32.mrf.mxu0 }
 0x41c   : > { %v1359_v24 = vmax.f32 %v1354_v22, 0.0 }
 0x41d   : > { %v1356_v25 = vpop.f32.mrf.mxu0 }
 0x41e   : > { %v1360_v26 = vpack.c.bf16 %v1359_v24, %v1359_v24 }
 0x41f   : > { %v1695_v27 = vpop.f32.mrf.mxu0 }
 0x420   : > { %1701 = vmatmul.mubr.msk.bf16.vlgmr.msra.gmra.mxu1 %vm553_vm4, %v1360_v26 }
 0x4e0   : > { %v1421_v29 = vpop.f32.mrf.mxu1 }
 0x4e1   : > { %v1422_v30 = vadd.f32 %v1595_v28, %v1421_v29 }
 0x4e2   : > { %v1702_v31 = vpop.f32.mrf.mxu1 }
 0x4e3   : > { %1428 = vst.msk [vmem:[%s465_s30] sm:$0xff] %vm1427_vm5, %v1422_v30 }
 0x4e4   : > { %v1424_v32 = vpop.f32.mrf.mxu1 }
 0x4e6   : > { %v1703_v33 = vpop.f32.mrf.mxu1 }
 0x4e7 PF: > { %s25_s25 = sadd.s32 1, %s1899_s25  }
 0x4e8   : > { %p22_p2 = scmp.ge.s32.totalorder %s25_s25, 5  }
 0x4ea   :  { %24 = sbr.rel (!%p22_p2) target bundleno = 2 (0x2), region = 111 }
 0x4ef   :  { %1448 = vsyncpa [#allocation3], 1 }
 0x4f0   :  { %1450 = vsyncpa [#allocation3 + $0x1], 1 }
 0x4f1   :  { %1451 = vsyncpa [#allocation5], 1 }

</bundles_post_ra>
